<compile_context>
chip_gen: v6e
topology: v6e:2x2x1
jax: 0.10.0
libtpu: 0.0.40
codegen_flags: <defaults>
</compile_context>

<pallas_src>
import functools
import math

import jax
import jax.numpy as jnp
import numpy as np
from jax.experimental import pallas as pl
from jax.experimental.pallas import tpu as pltpu


# ----------------------------------------------------------------------------
# Parameter ("buffer") construction — deterministic, mirrors __init__ exactly.
# ----------------------------------------------------------------------------
def make_positional_encoding(d_model: int, max_len: int) -> jnp.ndarray:
    """Returns pe with shape (max_len, 1, d_model), matching the torch buffer."""
    position = np.arange(0, max_len, dtype=np.float32)[:, None]            # (L, 1)
    div_term = np.exp(np.arange(0, d_model, 2, dtype=np.float32)
                      * (-math.log(10000.0) / d_model))                    # (D/2,)
    pe = np.zeros((max_len, d_model), dtype=np.float32)
    pe[:, 0::2] = np.sin(position * div_term)
    pe[:, 1::2] = np.cos(position * div_term)
    return jnp.asarray(pe[:, None, :])                                     # (L, 1, D)


# ----------------------------------------------------------------------------
# Pallas kernel: PE add (sublane broadcast over batch) + inverted dropout.
# ----------------------------------------------------------------------------
def _pe_dropout_kernel(seed_ref, x_ref, pe_ref, o_ref, *, p: float, train: bool):
    # x_ref / o_ref : (tile_s, B, D)  native layout (D = lanes, B = sublanes)
    # pe_ref        : (tile_s, 1, D)  already in x.dtype; broadcast over the batch axis
    if train and p >= 1.0:
        # PyTorch semantics: dropout(p=1) zeroes everything.
        o_ref[...] = jnp.zeros(o_ref.shape, o_ref.dtype)
        return

    y = x_ref[...] + pe_ref[...]              # cheap sublane broadcast, no tile temp

    if train and p > 0.0:
        ts, bb, dd = x_ref.shape
        # Absolute element index -> mask independent of the chosen tile size.
        # TODO(synk): 32-bit flat index wraps for tensors with >= 2^31 elements.
        row = pl.program_id(0) * ts + jax.lax.broadcasted_iota(jnp.int32, (ts, bb, dd), 0)
        inner = (jax.lax.broadcasted_iota(jnp.int32, (1, bb, dd), 1) * dd
                 + jax.lax.broadcasted_iota(jnp.int32, (1, bb, dd), 2))    # tiny (1,B,D)
        idx = row * (bb * dd) + inner
        # Short counter hash (2 vector muls + xor-shift): ample quality for dropout and
        # ~2.5x fewer int32 VALU ops/element than the original fmix32 chain.
        h = idx.astype(jnp.uint32) ^ (seed_ref[0].astype(jnp.uint32)
                                      * jnp.uint32(0x9E3779B9))            # scalar mix
        h = h * jnp.uint32(0x85EBCA6B)
        h = h ^ (h >> jnp.uint32(16))
        h = h * jnp.uint32(0xC2B2AE35)
        thr = min(max(int(round(p * 4294967296.0)), 0), 4294967295)
        keep = h >= jnp.uint32(thr)                                        # P(keep) = 1-p
        scale = jnp.asarray(1.0 / (1.0 - p), dtype=y.dtype)
        y = jnp.where(keep, y * scale, jnp.zeros_like(y))

    o_ref[...] = y.astype(o_ref.dtype)


# ----------------------------------------------------------------------------
# Wrapper: tiling + pallas_call (no layout reshapes).
# ----------------------------------------------------------------------------
def positional_encoding_bf(x, pe, *, p: float = 0.1, train: bool = True,
                           seed: int = 0, tile_s: int | None = None):
    """x: (S, B, D).  pe: (max_len, 1, D) float32 buffer.  Returns dropout(x + pe[:S])."""
    S, B, D = x.shape
    # pe in x.dtype halves pe HBM traffic for bf16 activations (pe is only 1/B of x's bytes
    # to start with).  NOTE: D % 128 == 0 keeps loads/stores lane-dense (unmasked vst).
    # TODO(synk): torch promotes bf16 x + f32 pe to f32; here compute/output stay in x.dtype.
    pe_s = pe[:S].astype(x.dtype)                       # (S, 1, D), native layout

    if tile_s is None:
        # ~4 MiB x/out blocks (streaming adds plateau ~85% of HBM roofline there) and at
        # least 2 grid steps so v7x can shard the "parallel" axis over both TensorCores.
        target_bytes = 4 * 1024 * 1024
        row_bytes = B * D * x.dtype.itemsize
        tile_s = max(1, min(S, target_bytes // max(1, row_bytes)))
        if S >= 2:
            tile_s = min(tile_s, pl.cdiv(S, 2))
        if tile_s >= 8:
            tile_s = (tile_s // 8) * 8                  # nice-to-have row alignment
    tile_s = int(min(max(1, int(tile_s)), S))

    grid = (pl.cdiv(S, tile_s),)
    seed_arr = jnp.asarray([seed], dtype=jnp.int32)
    kernel = functools.partial(_pe_dropout_kernel, p=float(p), train=bool(train))

    return pl.pallas_call(
        kernel,
        out_shape=jax.ShapeDtypeStruct((S, B, D), x.dtype),
        grid_spec=pltpu.PrefetchScalarGridSpec(
            num_scalar_prefetch=1,
            grid=grid,
            in_specs=[
                pl.BlockSpec((tile_s, B, D), lambda i, seed: (i, 0, 0)),
                pl.BlockSpec((tile_s, 1, D), lambda i, seed: (i, 0, 0)),
            ],
            out_specs=pl.BlockSpec((tile_s, B, D), lambda i, seed: (i, 0, 0)),
        ),
        # Output reuses x's HBM buffer (x is operand index 1 after the scalar-prefetch seed).
        input_output_aliases={1: 0},
        compiler_params=pltpu.CompilerParams(
            dimension_semantics=("parallel",),          # grid steps fully independent
            vmem_limit_bytes=48 * 1024 * 1024,          # double-buffered blocks + int32 hash
        ),                                              # temps, < v7x's 64 MiB physical VMEM
    )(seed_arr, x, pe_s)


# ----------------------------------------------------------------------------
# Demo / self-check
# ----------------------------------------------------------------------------
if __name__ == "__main__":
    d_model = 128          # multiple of 128 -> lane-dense loads/stores
    max_len = 64
    S, B = 16, 4
    p = 0.1

    key = jax.random.PRNGKey(0)
    x = jax.random.normal(key, (S, B, d_model), dtype=jnp.float32)
    pe = make_positional_encoding(d_model, max_len)

    ref = np.asarray(x) + np.asarray(pe[:S])

    # Eval mode (dropout = identity): exact check against pure reference.
    out_eval = jax.block_until_ready(positional_encoding_bf(x, pe, p=p, train=False))
    np.testing.assert_allclose(np.asarray(out_eval), ref, rtol=1e-6, atol=1e-6)

    # Train mode: inverted dropout — every surviving element equals ref / (1 - p),
    # dropped elements are exactly 0.
    out_train = jax.block_until_ready(
        positional_encoding_bf(x, pe, p=p, train=True, seed=123))
    ot = np.asarray(out_train)
    kept = ot != 0.0
    np.testing.assert_allclose(ot[kept], ref[kept] / (1.0 - p), rtol=1e-5, atol=1e-5)

    # Mask depends only on (absolute element index, seed) -> identical across tilings.
    out_train_t4 = jax.block_until_ready(
        positional_encoding_bf(x, pe, p=p, train=True, seed=123, tile_s=4))
    np.testing.assert_allclose(np.asarray(out_train_t4), ot, rtol=0.0, atol=0.0)

    print("KERNEL_OK")
</pallas_src>

<mosaic_0001>
module attributes {stable_mosaic.version = 11 : i64} {
  func.func @_pe_dropout_kernel(%arg0: i32, %arg1: memref<1xi32, #tpu.memory_space<smem>>, %arg2: memref<8x4x128xf32, #tpu.memory_space<vmem>>, %arg3: memref<8x1x128xf32, #tpu.memory_space<vmem>>, %arg4: memref<8x4x128xf32, #tpu.memory_space<vmem>>) attributes {dimension_semantics = [#tpu.dimension_semantics<parallel>], iteration_bounds = array<i64: 2>, scalar_prefetch = 1 : i64, scratch_operands = 0 : i64, tpu.core_type = #tpu.core_type<tc>, window_params = [{transform_indices = @transform_0, window_bounds = array<i64: 8, 4, 128>}, {transform_indices = @transform_1, window_bounds = array<i64: 8, 1, 128>}, {transform_indices = @transform_2, window_bounds = array<i64: 8, 4, 128>}]} {
    %c0 = arith.constant 0 : index
    %c0_0 = arith.constant 0 : index
    %c0_1 = arith.constant 0 : index
    %0 = vector.load %arg2[%c0, %c0_0, %c0_1] : memref<8x4x128xf32, #tpu.memory_space<vmem>>, vector<8x4x128xf32>
    %c0_2 = arith.constant 0 : index
    %c0_3 = arith.constant 0 : index
    %c0_4 = arith.constant 0 : index
    %1 = vector.load %arg3[%c0_2, %c0_3, %c0_4] : memref<8x1x128xf32, #tpu.memory_space<vmem>>, vector<8x1x128xf32>
    %2 = vector.broadcast %1 : vector<8x1x128xf32> to vector<8x4x128xf32>
    %3 = arith.addf %0, %2 : vector<8x4x128xf32>
    %c0_5 = arith.constant 0 : index
    %c0_6 = arith.constant 0 : index
    %c0_7 = arith.constant 0 : index
    %4 = vector.load %arg4[%c0_5, %c0_6, %c0_7] : memref<8x4x128xf32, #tpu.memory_space<vmem>>, vector<8x4x128xf32>
    tpu.vector_store %arg4[%c0_5, %c0_6, %c0_7], %3 {strides = array<i32>} : memref<8x4x128xf32, #tpu.memory_space<vmem>>, vector<8x4x128xf32>,
    return
  }
  func.func @transform_0(%arg0: i32, %arg1: memref<1xi32, #tpu.memory_space<smem>>) -> (i32, i32, i32) {
    %c0_i32 = arith.constant 0 : i32
    %c0_i32_0 = arith.constant 0 : i32
    %c0_i32_1 = arith.constant 0 : i32
    return %arg0, %c0_i32, %c0_i32_0 : i32, i32, i32
  }
  func.func @transform_1(%arg0: i32, %arg1: memref<1xi32, #tpu.memory_space<smem>>) -> (i32, i32, i32) {
    %c0_i32 = arith.constant 0 : i32
    %c0_i32_0 = arith.constant 0 : i32
    %c0_i32_1 = arith.constant 0 : i32
    return %arg0, %c0_i32, %c0_i32_0 : i32, i32, i32
  }
  func.func @transform_2(%arg0: i32, %arg1: memref<1xi32, #tpu.memory_space<smem>>) -> (i32, i32, i32) {
    %c0_i32 = arith.constant 0 : i32
    %c0_i32_0 = arith.constant 0 : i32
    %c0_i32_1 = arith.constant 0 : i32
    return %arg0, %c0_i32, %c0_i32_0 : i32, i32, i32
  }
}

</mosaic_0001>

<bundles_post_ra>
// kernel: tpu_custom_call.1
= control target key start
LH: loop header
LB: loop body
LE: loop exit
PB: predicated region body
PF: predicated region fallthrough
CT: control target
= control target key end

     0   :  { %9 = vsyncpa [#allocation5], 0  ;;  %s747_s0 = inlined_call_operand.<no memory space> [shape: s32[1], index: 0, kind: input, shape index: {}]   ;;  %s748_s1 = inlined_call_operand.hbm [shape: f32[16,4,128], index: 1, kind: input, shape index: {}, may-alias: {1,3}]   ;;  %s749_s2 = inlined_call_operand.vmem [shape: f32[16,1,128], index: 2, kind: input, shape index: {}]   ;;  %s750_s3 = inlined_call_operand.hbm [shape: f32[16,4,128], index: 3, kind: output, shape index: {}, may-alias: {1,3}]  }
   0x1   :  { %11 = vsyncpa [#allocation5 + $0x1], 0 }
   0x2   :  { %12 = vsyncpa [#allocation6], 0 }
   0x3   :  { %14 = vsyncpa [#allocation6 + $0x1], 0  ;;  %s556_s12 = smov 0   ;;  %s558_s13 = smov 0  }
   0x4   :  { %s560_s14 = smov 0   ;;  %s562_s0 = smov 0  }
   0x5 LB: > { %s577_s15 = sadd.s32 4294967295, %s528_s0   ;;  %s361_s16 = sadd.s32 4294967294, %s528_s0   ;;  %s528_s0 = sphi %s562_s0, %s765_s0   ;;  %s524_s14 = sphi %s560_s14, %s764_s14   ;;  %s520_s13 = sphi %s558_s13, %s763_s13   ;;  %s516_s12 = sphi %s556_s12, %s762_s12  }
   0x6   : > { %s581_s17 = sadd.s32 1, %s528_s0   ;;  %s27_s18 = sadd.s32 1, %s524_s14 }
   0x7   : > { %s24_s19 = ssub.s32 %s528_s0, %s581_s17  ;;  %p34_p0 = scmp.ne.s32.totalorder %s524_s14, %s520_s13 }
   0x8   : > { %p25_p1 = scmp.eq.s32.totalorder %s24_s19, 0  ;;  %p35_p2 = scmp.eq.s32.totalorder %s528_s0, 0 }
   0x9   : > { %p40_p3 = scmp.ne.s32.totalorder %s520_s13, %s516_s12  ;;  %p41_p4 = scmp.eq.s32.totalorder %s577_s15, 0 }
   0xa   : > { %s593_s20 = scalar_select %p25_p1, %s524_s14, %s27_s18  }
   0xb   : > { %p595_p5 = por %p35_p2, %p34_p0  ;;  %p599_p6 = por %p41_p4, %p40_p3 }
   0xc   : > { %p90_p7 = scmp.eq.s32.totalorder %s577_s15, 1  ;;  %p96_p8 = scmp.eq.s32.totalorder %s361_s16, 1 }
   0xd   : > { %s754_s22 = scalar_select %p599_p6, 1, 0 }
   0xe   : > { %p398_p10 = scmp.lt.s32.totalorder %s528_s0, 2  ;;  %p606_p11 = por %p90_p7, %p34_p0 }
   0xf   : > { %p610_p12 = por %p96_p8, %p40_p3  ;;  %s116_s25 = sand.u32 1, %s524_s14  }
  0x10   : > { %s755_s23 = scalar_select %p606_p11, 1, 0 }
  0x11   : > { %s756_s24 = scalar_select %p610_p12, 1, 0 }
  0x12   : > { %s384_s26 = sshll.u32 %s528_s0, 9  ;;  %s364_s27 = sshll.u32 %s116_s25, 5 }
  0x13   : > { %s619_s30 = scalar_lea.hbm %s748_s1, %s384_s26  ;;  %s120_s4 = scalar_lea.vmem [#allocation4], %s364_s27 }
  0x14   : > { %s127_s5 = sshll.u32 %s120_s4, 4  ;;  %p623_p13 = pnand %p398_p10, %p595_p5  ;;  %s627_s5 = int_to_ptr.vmem [resolvable:$true] %s127_s5 }
  0x15   : > { %s629_s7 = scalar_lea.sflag [#allocation5], %s116_s25  ;;  %s436_s8 = scalar_lea.hbm %s619_s30, 512 }
  0x16   : > { %p437_p0 = scmp.ne.s32.totalorder %s619_s30, %s436_s8  ;;  %p438_p1 = pneg %p623_p13 }
  0x17   : > { %s441_s11 = scalar_lea.hbm %s748_s1, 1024  ;;  %p442_p4 = scmp.lt.s32.totalorder %s619_s30, %s748_s1 }
  0x18   : > { %p439_p2 = pnand %p438_p1, %p437_p0  ;;  %p443_p5 = scmp.lt.s32.totalorder %s441_s11, %s436_s8 }
  0x1a   : > { %p440_p3 = pneg %p439_p2  ;;  %p444_p7 = por %p443_p5, %p442_p4 }
  0x1c   : > { %p445_p8 = pnand %p444_p7, %p440_p3 }
  0x1e   : > { %448 = shalt.err (!%p445_p8)
}
  0x1f   : > { %s449_s19 = scalar_lea.vmem %s627_s5, 512  ;;  %s530_s21 = smov [#allocation4]  }
  0x20   : > { %p450_p10 = scmp.ne.s32.totalorder %s627_s5, %s449_s19  ;;  %s454_s25 = sshll.u32 %s530_s21, 4  ;;  %s455_s25 = int_to_ptr.vmem [resolvable:$false] %s454_s25 }
  0x21   : > { %s456_s26 = scalar_lea.vmem %s455_s25, 1024  ;;  %p457_p2 = scmp.lt.s32.totalorder %s627_s5, %s455_s25 }
  0x22   : > { %p452_p9 = pnand %p450_p10, %p438_p1  ;;  %p458_p12 = scmp.lt.s32.totalorder %s456_s26, %s449_s19 }
  0x24   : > { %p453_p0 = pneg %p452_p9  ;;  %p459_p11 = por %p458_p12, %p457_p2 }
  0x26   : > { %p460_p6 = pnand %p459_p11, %p453_p0 }
  0x28   : > { %463 = shalt.err (!%p460_p6)
}
  0x29   : > { %s531_s27 = smov 64   ;;  %s532_s28 = smov 4  }
  0x2a   : > { %393 = dma.hbm_to_vmem [thread:$0]  (!%p623_p13), %s619_s30, 512, %s627_s5, %s629_s7, %s531_s27, %s531_s27, %s532_s28  }
  0x2b   : > { %p367_p9 = scmp.ge.s32.totalorder %s528_s0, 1  ;;  %p143_p1 = scmp.lt.s32.totalorder %s528_s0, 3 }
  0x2d   : > { %p144_p3 = pnand %p367_p9, %p143_p1 }
  0x2e   : > { %s653_s29 = sand.u32 (!%p144_p3), 1, %s520_s13   ;;  %p758_p6 = scmp.ne.s32.totalorder (!%p144_p3), %s754_s22, 0 }
  0x2f   : > { %147 = sbr.rel (%p144_p3) target bundleno = 82 (0x52), region = 28  ;;  %s368_s4 = sshll.u32 (!%p144_p3), %s653_s29, 5 }
  0x30   : > { %s150_s8 = scalar_lea.sflag (!%p144_p3), [#allocation5], %s653_s29  ;;  %s657_s9 = scalar_lea.vmem (!%p144_p3), [#allocation4], %s368_s4 }
  0x34   : > { %507 = dma.done.wait (%p758_p6), %s150_s8, 512  }
  0x35   : > { %509 = vsyncadd (%p758_p6), %s150_s8, 4294966784  ;;  %s370_s30 = sshll.u32 %s577_s15, 3  ;;  %s669_s22 = scalar_lea.vmem [#allocation7], %s368_s4  ;;  %v185_v0 = vld [vmem:[%s657_s9] sm:$0xf] }
  0x36   : > { %p180_p11 = scmp.lt.s32.totalorder %s370_s30, 15  ;;  %s279_s10 = sshll.u32 %s669_s22, 4  ;;  %v186_v2 = vld [vmem:[%s657_s9 + $0x4] sm:$0xf]  ;;  %v187_v5 = vld [vmem:[%s657_s9 + $0x8] sm:$0xf]  ;;  %s686_s10 = int_to_ptr.vmem [resolvable:$true] %s279_s10 }
  0x37   : > { %s385_s11 = sshll.u32 %s577_s15, 9  ;;  %v188_v9 = vld [vmem:[%s657_s9 + $0xc] sm:$0xf]  ;;  %v189_v11 = vld [vmem:[%s657_s9 + $0x10] sm:$0xf]  ;;  %s266_s21 = scalar_lea.sflag [#allocation6], %s653_s29 }
  0x38   : > { %s767_s30 = smov (!%p180_p11, %s370_s30), 15  ;;  %v190_v14 = vld [vmem:[%s657_s9 + $0x14] sm:$0xf]  ;;  %v191_v18 = vld [vmem:[%s657_s9 + $0x18] sm:$0xf]  ;;  %s702_s19 = scalar_lea.hbm %s750_s3, %s385_s11 }
  0x39   : > { %s667_s7 = scalar_lea.vmem %s749_s2, %s767_s30  ;;  %v192_v20 = vld [vmem:[%s657_s9 + $0x1c] sm:$0xf]  ;;  %s464_s25 = scalar_lea.vmem %s686_s10, 512 }
  0x3a   : > { %v371_v1 = vld [vmem:[%s667_s7] ss:$0 sm:$0xff]  ;;  %v372_v4 = vld [vmem:[%s667_s7 + $0x1] ss:$0 sm:$0xff]  ;;  %v373_v6 = vld [vmem:[%s667_s7 + $0x2] ss:$0 sm:$0xff]  ;;  %p465_p12 = scmp.ne.s32.totalorder %s686_s10, %s464_s25 }
  0x3b   : > { %v249_v3 = vadd.f32 %v371_v1, %v185_v0  ;;  %v250_v7 = vadd.f32 %v372_v4, %v186_v2  ;;  %v251_v8 = vadd.f32 %v373_v6, %v187_v5  ;;  %v374_v10 = vld [vmem:[%s667_s7 + $0x3] ss:$0 sm:$0xff]  ;;  %v375_v13 = vld [vmem:[%s667_s7 + $0x4] ss:$0 sm:$0xff]  ;;  %v376_v15 = vld [vmem:[%s667_s7 + $0x5] ss:$0 sm:$0xff] }
  0x3c   : > { %v252_v12 = vadd.f32 %v374_v10, %v188_v9  ;;  %v253_v16 = vadd.f32 %v375_v13, %v189_v11  ;;  %v254_v17 = vadd.f32 %v376_v15, %v190_v14  ;;  %v377_v19 = vld [vmem:[%s667_s7 + $0x6] ss:$0 sm:$0xff]  ;;  %v378_v22 = vld [vmem:[%s667_s7 + $0x7] ss:$0 sm:$0xff]  ;;  %p759_p13 = scmp.ne.s32.totalorder %s755_s23, 0  ;;  %s533_s26 = smov [#allocation7]  }
  0x3d   : > { %257 = vst [vmem:[%s669_s22] sm:$0xf] %v249_v3  ;;  %258 = vst [vmem:[%s669_s22 + $0x4] sm:$0xf] %v250_v7  ;;  %v255_v21 = vadd.f32 %v377_v19, %v191_v18  ;;  %v256_v23 = vadd.f32 %v378_v22, %v192_v20  ;;  %s468_s27 = sshll.u32 %s533_s26, 4  ;;  %s469_s27 = int_to_ptr.vmem [resolvable:$false] %s468_s27 }
  0x3e   : > { %259 = vst [vmem:[%s669_s22 + $0x8] sm:$0xf] %v251_v8  ;;  %260 = vst [vmem:[%s669_s22 + $0xc] sm:$0xf] %v252_v12  ;;  %p466_p4 = pnand %p465_p12, %p759_p13  ;;  %s470_s28 = scalar_lea.vmem %s469_s27, 1024 }
  0x3f   : > { %261 = vst [vmem:[%s669_s22 + $0x10] sm:$0xf] %v253_v16  ;;  %262 = vst [vmem:[%s669_s22 + $0x14] sm:$0xf] %v254_v17  ;;  %p471_p7 = scmp.lt.s32.totalorder %s686_s10, %s469_s27  ;;  %p472_p8 = scmp.lt.s32.totalorder %s470_s28, %s464_s25 }
  0x40   : > { %263 = vst [vmem:[%s669_s22 + $0x18] sm:$0xf] %v255_v21  ;;  %264 = vst [vmem:[%s669_s22 + $0x1c] sm:$0xf] %v256_v23  ;;  %p467_p5 = pneg %p466_p4 }
  0x41   : > { %p473_p10 = por %p472_p8, %p471_p7 }
  0x43   : > { %p474_p0 = pnand %p473_p10, %p467_p5 }
  0x45   : > { %477 = shalt.err (!%p474_p0)
}
  0x46   : > { %s478_s15 = scalar_lea.hbm %s702_s19, 512  ;;  %s482_s9 = scalar_lea.hbm %s750_s3, 1024 }
  0x47   : > { %p479_p2 = scmp.ne.s32.totalorder %s702_s19, %s478_s15  ;;  %p483_p3 = scmp.lt.s32.totalorder %s702_s19, %s750_s3 }
  0x48   : > { %p484_p6 = scmp.lt.s32.totalorder %s482_s9, %s478_s15 }
  0x49   : > { %p480_p9 = pnand %p479_p2, %p759_p13 }
  0x4a   : > { %p485_p11 = por %p484_p6, %p483_p3 }
  0x4b   : > { %p481_p1 = pneg %p480_p9 }
  0x4d   : > { %p486_p12 = pnand %p485_p11, %p481_p1 }
  0x4f   : > { %489 = shalt.err (!%p486_p12)
}
  0x50   : > { %s534_s6 = smov 64   ;;  %s535_s7 = smov 4  }
  0x51   : > { %388 = dma.vmem_to_hbm [thread:$0]  (%p759_p13), %s686_s10, 512, %s702_s19, %s266_s21, %s534_s6, %s534_s6, %s535_s7  }
  0x52 PF: > { %s294_s22 = sand.u32 1, %s516_s12   ;;  %p760_p4 = scmp.ne.s32.totalorder %s756_s24, 0 }
  0x53   : > { %p761_p5 = scmp.ge.s32.totalorder %s528_s0, 2  ;;  %s295_s11 = scalar_lea.sflag [#allocation6], %s294_s22 }
  0x55   : > { %p395_p7 = pnand %p761_p5, %p760_p4 }
  0x57   : > { %p396_p8 = pneg %p395_p7 }
  0x59   : > { %511 = dma.done.wait (%p396_p8), %s295_s11, 512  }
  0x5a   : > { %513 = vsyncadd (%p396_p8), %s295_s11, 4294966784  ;;  %p17_p10 = scmp.ge.s32.totalorder %s581_s17, 4   ;;  %s762_s12 = smov %s520_s13 }
  0x5b   : > { %s763_s13 = smov %s524_s14  ;;  %s764_s14 = smov %s593_s20 }
  0x5c   : > { %s765_s0 = smov %s581_s17  ;;  %19 = sbr.rel (!%p17_p10) target bundleno = 5 (0x5), region = 76 }
  0x61   :  { %300 = vsyncpa [#allocation5], 1 }
  0x62   :  { %302 = vsyncpa [#allocation5 + $0x1], 1 }
  0x63   :  { %303 = vsyncpa [#allocation6], 1 }
  0x64   :  { %305 = vsyncpa [#allocation6 + $0x1], 1 }

</bundles_post_ra>
